<compile_context>
chip_gen: v7x
topology: tpu7x:2x2x1
jax: 0.10.0
libtpu: 0.0.40
codegen_flags: <defaults>
</compile_context>

<pallas_src>
import math
import numpy as np
import jax
import jax.numpy as jnp
from jax.experimental import pallas as pl
from jax.experimental.pallas import tpu as pltpu


# ---------------------------------------------------------------------------
# Positional encoding (parameter prep — plain numpy, matches the PyTorch ref)
# ---------------------------------------------------------------------------
def init_positional_encoding(hidden_dim, max_seq_len):
    position_enc = np.array(
        [
            [pos / np.power(10000, 2 * i / hidden_dim) for i in range(hidden_dim)]
            if pos != 0
            else np.zeros(hidden_dim)
            for pos in range(max_seq_len)
        ]
    )
    position_enc[1:, 0::2] = np.sin(position_enc[1:, 0::2])
    position_enc[1:, 1::2] = np.cos(position_enc[1:, 1::2])
    denominator = np.sqrt(np.sum(position_enc ** 2, axis=1, keepdims=True))
    position_enc = position_enc / (denominator + 1e-08)
    return position_enc.astype(np.float32)  # (max_seq_len, hidden_dim)


# ---------------------------------------------------------------------------
# Kernel: one (TM, In) @ (In, TN) matmul + (PE + bias) add, f32 epilogue
# ---------------------------------------------------------------------------
def _embeddings_kernel(x_ref, w_ref, pb_ref, o_ref):
    # x_ref:  (TM, In)   streaming row tile
    # w_ref:  (In, TN)   weight tile (resident / constant across inner axis)
    # pb_ref: (TM, TN)   positional encoding + bias, f32 (resident)
    # o_ref:  (TM, TN)
    y = jnp.dot(x_ref[...], w_ref[...], preferred_element_type=jnp.float32)
    o_ref[...] = (y + pb_ref[...]).astype(o_ref.dtype)


# ---------------------------------------------------------------------------
# Tile / VMEM planning
# ---------------------------------------------------------------------------
def _row_align(dtype):
    # Native sublane packing: f32 -> 8 rows, bf16 -> 16, int8/fp8 -> 32.
    return max(8, 32 // jnp.dtype(dtype).itemsize)


def _pick_row_k(B, S, align, target_tm):
    """Largest k | B with k*S <= target_tm, preferring (k*S) % align == 0."""
    best, best_aligned = None, None
    for k in range(1, B + 1):
        if B % k:
            continue
        tm = k * S
        if tm > target_tm:
            break
        best = k
        if tm % align == 0:
            best_aligned = k
    if best_aligned is not None:
        return best_aligned
    if best is not None:
        return best
    return 1  # TM = S: smallest whole-sequence tile


def _pick_col_tile(H, target_tn):
    # Power-of-two multiples of 128 only (v5e-friendly), else full H.
    if H % 128 == 0:
        for cand in (1024, 512, 256, 128):
            if cand <= target_tn and H % cand == 0:
                return cand
        return 128
    return H  # full-dim exception


def _vmem_capacity_bytes():
    try:
        info = pltpu.get_tpu_info()
        cap = getattr(info, "vmem_capacity_bytes", None)
        if cap:
            return int(cap)
    except Exception:
        pass
    return 64 << 20  # conservative default (v7x per-TensorCore)


def _select_plan(B, S, In, H, in_sz, w_sz, out_sz, align, budget,
                 target_tm, target_tn, force_path=None):
    # --- Resident path: W (In,H) + PE (TM,H) pinned in VMEM, 1-D row grid ---
    if force_path != "tiled":
        tm_cap = target_tm
        while True:
            k = _pick_row_k(B, S, align, tm_cap)
            TM = k * S
            fp = (2 * TM * In * in_sz      # x tile, double-buffered
                  + 2 * In * H * w_sz      # resident weight (2x headroom)
                  + 2 * TM * H * 4         # resident PE+bias, f32 (2x headroom)
                  + 2 * TM * H * out_sz)   # out tile, double-buffered
            if fp <= budget or force_path == "resident":
                return dict(path="resident", k=k, TM=TM, TN=H, fp=fp)
            if tm_cap > S:
                tm_cap = max(S, tm_cap // 2)
            else:
                break  # even TM == S doesn't fit with resident W/PE

    # --- Tiled fallback: column-major grid, column blocks for W / PE --------
    TN = _pick_col_tile(H, target_tn)
    tm_cap = target_tm
    while True:
        k = _pick_row_k(B, S, align, tm_cap)
        TM = k * S
        fp = 2 * (TM * In * in_sz + In * TN * w_sz + TM * TN * 4 + TM * TN * out_sz)
        if fp <= budget:
            break
        if TN > 128 and H % (TN // 2) == 0:
            TN //= 2
        elif tm_cap > S:
            tm_cap = max(S, tm_cap // 2)
        else:
            break  # smallest config; vmem_limit will cover it
    return dict(path="tiled", k=k, TM=TM, TN=TN, fp=fp)


# ---------------------------------------------------------------------------
# Wrapper
# ---------------------------------------------------------------------------
def crazy_thursday_embeddings(input_tensor, weight_t, bias, positional_enc, *,
                              out_dtype=None, _target_tm=None, _target_tn=None,
                              _force_path=None):
    """Fused Linear + positional-encoding add.

    input_tensor:   (B, S, In)
    weight_t:       (In, H)  -- nn.Linear weight, pre-transposed ONCE at prep
    bias:           (H,)     f32
    positional_enc: (max_pos, H) f32
    returns:        (B, S, H) in `out_dtype` (default: input dtype)
    """
    B, S, In = input_tensor.shape
    H = weight_t.shape[1]
    assert weight_t.shape[0] == In
    assert S <= positional_enc.shape[0], (
        f"seq len {S} exceeds max_position_embeddings {positional_enc.shape[0]}")
    out_dtype = out_dtype or input_tensor.dtype

    R = B * S
    x2d = input_tensor.reshape(R, In)

    # Fold bias into the PE slab (f32 epilogue math on all chips).
    pos_b = (positional_enc[:S, :].astype(jnp.float32)
             + bias.astype(jnp.float32)[None, :])                   # (S, H)

    in_sz = jnp.dtype(input_tensor.dtype).itemsize
    w_sz = jnp.dtype(weight_t.dtype).itemsize
    out_sz = jnp.dtype(out_dtype).itemsize

    # Generation-aware VMEM budget and tile targets.
    cap = _vmem_capacity_bytes()
    budget = int(0.70 * cap)
    big_vmem = cap >= (96 << 20)                  # v5e/v6e 128 MiB vs v7x 64 MiB
    target_tm = _target_tm or (1024 if big_vmem else 512)
    target_tn = _target_tn or (512 if big_vmem else 256)
    align = max(_row_align(input_tensor.dtype), _row_align(out_dtype))

    plan = _select_plan(B, S, In, H, in_sz, w_sz, out_sz, align, budget,
                        target_tm, target_tn, _force_path)
    k, TM, TN, fp = plan["k"], plan["TM"], plan["TN"], plan["fp"]
    n_row = R // TM

    # PE+bias repeated k times -> one (TM, H) slab shared by all row tiles
    # (rows within a tile are whole sequences).
    pos_tile = jnp.tile(pos_b, (k, 1))                               # (TM, H)

    # Scoped VMEM limit: covers the real footprint, never exceeds ~0.9*capacity.
    vmem_limit = int(min(max(fp + (8 << 20), 32 << 20), int(0.9 * cap)))
    vmem_limit = max(vmem_limit, int(fp))

    cost = pl.CostEstimate(
        flops=int(2 * R * In * H),
        transcendentals=0,
        bytes_accessed=int(R * In * in_sz + In * H * w_sz
                           + TM * H * 4 + R * H * out_sz),
    )

    if plan["path"] == "resident":
        # 1-D grid over row tiles; W and PE+bias have constant block indices
        # -> DMA'd from HBM exactly once, revisited across all row steps.
        grid = (n_row,)
        in_specs = [
            pl.BlockSpec((TM, In), lambda i: (i, 0)),    # x: streams over rows
            pl.BlockSpec((In, H), lambda i: (0, 0)),     # W: resident
            pl.BlockSpec((TM, H), lambda i: (0, 0)),     # PE+bias: resident
        ]
        out_specs = pl.BlockSpec((TM, H), lambda i: (i, 0))
        dims = ("parallel",)
    else:
        # Column-major grid: W / PE block index constant across the inner row
        # axis -> fetched n_col times total (not n_row * n_col).
        n_col = H // TN
        grid = (n_col, n_row)
        in_specs = [
            pl.BlockSpec((TM, In), lambda j, i: (i, 0)),
            pl.BlockSpec((In, TN), lambda j, i: (0, j)),
            pl.BlockSpec((TM, TN), lambda j, i: (0, j)),
        ]
        out_specs = pl.BlockSpec((TM, TN), lambda j, i: (i, j))
        dims = ("parallel", "parallel")

    out2d = pl.pallas_call(
        _embeddings_kernel,
        out_shape=jax.ShapeDtypeStruct((R, H), out_dtype),
        grid_spec=pltpu.PrefetchScalarGridSpec(
            num_scalar_prefetch=0,
            grid=grid,
            in_specs=in_specs,
            out_specs=out_specs,
        ),
        compiler_params=pltpu.CompilerParams(
            dimension_semantics=dims,
            vmem_limit_bytes=vmem_limit,
        ),
        cost_estimate=cost,
    )(x2d, weight_t, pos_tile)

    return out2d.reshape(B, S, H)


# ---------------------------------------------------------------------------
# Main
# ---------------------------------------------------------------------------
def _run_case(key, B, S, In, H, max_pos, dtype, rtol, atol, **knobs):
    k_x, k_w, k_b = jax.random.split(key, 3)
    x = jax.random.normal(k_x, (B, S, In), dtype=jnp.float32)

    # Synthetic nn.Linear(In, H) init: U(-1/sqrt(In), 1/sqrt(In)).
    bound = 1.0 / math.sqrt(In)
    weight = jax.random.uniform(k_w, (H, In), minval=-bound, maxval=bound,
                                dtype=jnp.float32)
    bias = jax.random.uniform(k_b, (H,), minval=-bound, maxval=bound,
                              dtype=jnp.float32)
    pos_enc = jnp.asarray(init_positional_encoding(H, max_pos))      # (max_pos, H)

    # Parameter prep (done once, outside the per-call path): transpose + cast.
    w_t = weight.T.astype(dtype)                                     # (In, H)
    x_in = x.astype(dtype)

    out = crazy_thursday_embeddings(x_in, w_t, bias, pos_enc,
                                    out_dtype=dtype, **knobs)
    out = jax.block_until_ready(out)
    assert out.shape == (B, S, H)

    # Reference (plain JAX, same math as the PyTorch forward), computed from
    # the same (possibly bf16-rounded) operands in f32.
    xr = x_in.astype(jnp.float32)
    wr = w_t.astype(jnp.float32)
    ref = (jnp.einsum("bsi,ih->bsh", xr, wr)
           + bias[None, None, :] + pos_enc[None, :S, :])
    np.testing.assert_allclose(np.asarray(out, dtype=np.float32),
                               np.asarray(ref), rtol=rtol, atol=atol)


if __name__ == "__main__":
    key = jax.random.PRNGKey(0)
    keys = jax.random.split(key, 5)

    # Small config consistent with the module's forward (strict f32 check).
    _run_case(keys[0], B=2, S=8, In=16, H=32, max_pos=16,
              dtype=jnp.float32, rtol=1e-5, atol=1e-5)

    # Lane-dense config, resident W/PE, f32 strict check.
    _run_case(keys[1], B=4, S=64, In=256, H=256, max_pos=128,
              dtype=jnp.float32, rtol=1e-5, atol=1e-5)

    # bf16 operand/out path (halves HBM traffic; f32 MXU accumulation,
    # f32 epilogue add) with a looser tolerance.
    _run_case(keys[2], B=4, S=64, In=256, H=256, max_pos=128,
              dtype=jnp.bfloat16, rtol=5e-2, atol=5e-2)

    # Multi-row-tile resident path: W / PE DMA'd once, revisited across 4 steps.
    _run_case(keys[3], B=8, S=64, In=128, H=256, max_pos=64,
              dtype=jnp.float32, rtol=1e-5, atol=1e-5, _target_tm=128)

    # Column-tiled fallback path (large-In*H escape hatch), multi-step both axes.
    _run_case(keys[4], B=4, S=64, In=128, H=512, max_pos=64,
              dtype=jnp.float32, rtol=1e-5, atol=1e-5,
              _force_path="tiled", _target_tm=128, _target_tn=128)

    print("KERNEL_OK")
</pallas_src>

<mosaic_0001>
module attributes {stable_mosaic.version = 11 : i64} {
  func.func @_embeddings_kernel(%arg0: i32, %arg1: memref<16x16xf32, #tpu.memory_space<vmem>>, %arg2: memref<16x32xf32, #tpu.memory_space<vmem>>, %arg3: memref<16x32xf32, #tpu.memory_space<vmem>>, %arg4: memref<16x32xf32, #tpu.memory_space<vmem>>) attributes {dimension_semantics = [#tpu.dimension_semantics<parallel>], iteration_bounds = array<i64: 1>, scalar_prefetch = 0 : i64, scratch_operands = 0 : i64, tpu.core_type = #tpu.core_type<tc>, window_params = [{transform_indices = @transform_0, window_bounds = array<i64: 16, 16>}, {pipeline_mode = #tpu.pipeline_mode<synchronous>, transform_indices = @transform_1, window_bounds = array<i64: 16, 32>}, {pipeline_mode = #tpu.pipeline_mode<synchronous>, transform_indices = @transform_2, window_bounds = array<i64: 16, 32>}, {transform_indices = @transform_3, window_bounds = array<i64: 16, 32>}]} {
    %c0 = arith.constant 0 : index
    %c0_0 = arith.constant 0 : index
    %0 = vector.load %arg1[%c0, %c0_0] : memref<16x16xf32, #tpu.memory_space<vmem>>, vector<16x16xf32>
    %c0_1 = arith.constant 0 : index
    %c0_2 = arith.constant 0 : index
    %1 = vector.load %arg2[%c0_1, %c0_2] : memref<16x32xf32, #tpu.memory_space<vmem>>, vector<16x32xf32>
    %cst = arith.constant dense<0.000000e+00> : vector<16x32xf32>
    %2 = tpu.matmul %0, %1, %cst {dimension_numbers = #tpu.dot_dimension_numbers<[1], [0], [0], [1], [0, 0, 1, 1], [], []>} : vector<16x16xf32>, vector<16x32xf32>, vector<16x32xf32> -> vector<16x32xf32>
    %c0_3 = arith.constant 0 : index
    %c0_4 = arith.constant 0 : index
    %3 = vector.load %arg3[%c0_3, %c0_4] : memref<16x32xf32, #tpu.memory_space<vmem>>, vector<16x32xf32>
    %4 = arith.addf %2, %3 : vector<16x32xf32>
    %c0_5 = arith.constant 0 : index
    %c0_6 = arith.constant 0 : index
    %5 = vector.load %arg4[%c0_5, %c0_6] : memref<16x32xf32, #tpu.memory_space<vmem>>, vector<16x32xf32>
    tpu.vector_store %arg4[%c0_5, %c0_6], %4 {strides = array<i32>} : memref<16x32xf32, #tpu.memory_space<vmem>>, vector<16x32xf32>,
    return
  }
  func.func @transform_0(%arg0: i32) -> (i32, i32) {
    %c0_i32 = arith.constant 0 : i32
    %c0_i32_0 = arith.constant 0 : i32
    return %arg0, %c0_i32 : i32, i32
  }
  func.func @transform_1(%arg0: i32) -> (i32, i32) {
    %c0_i32 = arith.constant 0 : i32
    %c0_i32_0 = arith.constant 0 : i32
    %c0_i32_1 = arith.constant 0 : i32
    return %c0_i32, %c0_i32_0 : i32, i32
  }
  func.func @transform_2(%arg0: i32) -> (i32, i32) {
    %c0_i32 = arith.constant 0 : i32
    %c0_i32_0 = arith.constant 0 : i32
    %c0_i32_1 = arith.constant 0 : i32
    return %c0_i32, %c0_i32_0 : i32, i32
  }
  func.func @transform_3(%arg0: i32) -> (i32, i32) {
    %c0_i32 = arith.constant 0 : i32
    %c0_i32_0 = arith.constant 0 : i32
    return %arg0, %c0_i32 : i32, i32
  }
}

</mosaic_0001>

<bundles_post_ra>
// kernel: tpu_custom_call.1
= control target key start
LH: loop header
LB: loop body
LE: loop exit
PB: predicated region body
PF: predicated region fallthrough
CT: control target
= control target key end

     0   :  { %8 = vsyncpa [#allocation3], 0  ;;  %s375_s0 = inlined_call_operand.hbm [shape: f32[16,16], index: 0, kind: input, shape index: {}]   ;;  %s376_s1 = inlined_call_operand.hbm [shape: f32[16,32], index: 1, kind: input, shape index: {}]   ;;  %s377_s2 = inlined_call_operand.hbm [shape: f32[16,32], index: 2, kind: input, shape index: {}]   ;;  %s378_s3 = inlined_call_operand.hbm [shape: f32[16,32], index: 3, kind: output, shape index: {}]  }
   0x1   :  { %9 = vsyncpa [#allocation6], 0 }
   0x2   :  { %10 = vsyncpa [#allocation4], 0  ;;  %s282_s12 = smov [#allocation5]   ;;  %s283_s14 = smov [#allocation2]  }
   0x3   :  { %s28_s13 = sshll.u32 %s282_s12, 4  ;;  %s16_s15 = sshll.u32 %s283_s14, 4  ;;  %s29_s13 = int_to_ptr.vmem [resolvable:$true] %s28_s13  ;;  %s308_s15 = int_to_ptr.vmem [resolvable:$true] %s16_s15 }
   0x4   :  { %s188_s18 = scalar_lea.hbm %s376_s1, 256 }
   0x5   :  { %p189_p0 = scmp.ne.s32.totalorder %s376_s1, %s188_s18  ;;  %p192_p1 = scmp.lt.u32.totalorder %s188_s18, %s376_s1 }
   0x7   :  { %p194_p2 = pnand %p192_p1, %p189_p0 }
   0x9   :  { %197 = shalt.err (!%p194_p2)
}
   0xa   :  { %s198_s23 = scalar_lea.vmem %s29_s13, 256  ;;  %p203_p4 = scmp.lt.s32.totalorder %s29_s13, %s29_s13 }
   0xb   :  { %p199_p3 = scmp.ne.s32.totalorder %s29_s13, %s198_s23  ;;  %p204_p5 = scmp.lt.s32.totalorder %s198_s23, %s198_s23 }
   0xd   :  { %p205_p6 = por %p204_p5, %p203_p4 }
   0xf   :  { %p206_p7 = pnand %p205_p6, %p199_p3 }
  0x11   :  { %209 = shalt.err (!%p206_p7)
}
  0x12   :  { %s284_s24 = smov 128   ;;  %s285_s25 = smov 8  }
  0x13   :  { %34 = dma.hbm_to_vmem [thread:$0]  %s376_s1, 256, %s29_s13, [#allocation6], %s284_s24, %s284_s24, %s285_s25  }
  0x14   :  { %s210_s30 = scalar_lea.hbm %s375_s0, 256 }
  0x15   :  { %p211_p8 = scmp.ne.s32.totalorder %s375_s0, %s210_s30  ;;  %p214_p9 = scmp.lt.u32.totalorder %s210_s30, %s375_s0 }
  0x17   :  { %p216_p10 = pnand %p214_p9, %p211_p8 }
  0x19   :  { %219 = shalt.err (!%p216_p10)
}
  0x1a   :  { %s220_s8 = scalar_lea.vmem %s308_s15, 256  ;;  %p225_p12 = scmp.lt.s32.totalorder %s308_s15, %s308_s15 }
  0x1b   :  { %p221_p11 = scmp.ne.s32.totalorder %s308_s15, %s220_s8  ;;  %p226_p13 = scmp.lt.s32.totalorder %s220_s8, %s220_s8 }
  0x1d   :  { %p227_p0 = por %p226_p13, %p225_p12 }
  0x1f   :  { %p228_p1 = pnand %p227_p0, %p221_p11 }
  0x21   :  { %231 = shalt.err (!%p228_p1)
}
  0x22   :  { %22 = dma.hbm_to_vmem [thread:$0]  %s375_s0, 256, %s308_s15, [#allocation3], %s284_s24, %s284_s24, %s285_s25  }
  0x23   :  { %s286_s10 = smov [#allocation7]   ;;  %s232_s14 = scalar_lea.hbm %s377_s2, 256 }
  0x24   :  { %s40_s11 = sshll.u32 %s286_s10, 4  ;;  %p233_p2 = scmp.ne.s32.totalorder %s377_s2, %s232_s14  ;;  %s41_s11 = int_to_ptr.vmem [resolvable:$true] %s40_s11 }
  0x25   :  { %p236_p3 = scmp.lt.u32.totalorder %s232_s14, %s377_s2 }
  0x27   :  { %p238_p4 = pnand %p236_p3, %p233_p2 }
  0x29   :  { %241 = shalt.err (!%p238_p4)
}
  0x2a   :  { %s242_s20 = scalar_lea.vmem %s41_s11, 256  ;;  %p247_p6 = scmp.lt.s32.totalorder %s41_s11, %s41_s11 }
  0x2b   :  { %p243_p5 = scmp.ne.s32.totalorder %s41_s11, %s242_s20  ;;  %p248_p7 = scmp.lt.s32.totalorder %s242_s20, %s242_s20 }
  0x2d   :  { %p249_p8 = por %p248_p7, %p247_p6 }
  0x2f   :  { %p250_p9 = pnand %p249_p8, %p243_p5 }
  0x31   :  { %253 = shalt.err (!%p250_p9)
}
  0x32   :  { %46 = dma.hbm_to_vmem [thread:$0]  %s377_s2, 256, %s41_s11, [#allocation6], %s284_s24, %s284_s24, %s285_s25  }
  0x33   :  { %276 = dma.done.wait [#allocation3], 256  }
  0x34   :  { %277 = vsyncadd [#allocation3], 4294967040 }
  0x35   :  { %278 = dma.done.wait [#allocation6], 512  }
  0x36   :  { %279 = vsyncadd [#allocation6], 4294966784  ;;  %vm62_vm0 = vcmask 130048   ;;  %v58_v0 = vld [vmem:[#allocation5] sm:$0xff]  ;;  %v59_v1 = vld [vmem:[#allocation5 + $0x8] sm:$0xff]  ;;  %s287_s21 = smov [#allocation8]  }
  0x37   :  { %v56_v2 = vld [vmem:[#allocation2] sm:$0xff]  ;;  %v178_v3 = vpack.c.bf16 %v59_v1, %v58_v0  ;;  %v57_v4 = vld [vmem:[#allocation2 + $0x8] sm:$0xff]  ;;  %s152_s22 = sshll.u32 %s287_s21, 4  ;;  %vm144_vm1 = vcmask 261120   ;;  %s153_s22 = int_to_ptr.vmem [resolvable:$true] %s152_s22 }
  0x38   :  { %175 = vmatprep.mubr.msk.f32.mxu0 %vm62_vm0, %v56_v2  ;;  %v61_v5 = vld [vmem:[#allocation7 + $0x8] sm:$0xff]  ;;  %v60_v6 = vld [vmem:[#allocation7] sm:$0xff]  ;;  %s254_s2 = scalar_lea.vmem %s153_s22, 256  ;;  %p259_p11 = scmp.lt.s32.totalorder %s153_s22, %s153_s22 }
  0x39   :  { %179 = vmatprep.subr.bf16.mxu0 %v178_v3  ;;  %p255_p10 = scmp.ne.s32.totalorder %s153_s22, %s254_s2  ;;  %p260_p12 = scmp.lt.s32.totalorder %s254_s2, %s254_s2 }
  0x3a   :  { %181 = vmatpush3.bf16.msra.mxu0 %v178_v3 }
  0x3b   :  { %p261_p13 = por %p260_p12, %p259_p11 }
  0x3d   :  { %176 = vmatmul.mubr.msk.f32.vlgmr.msra.gmra.mrb[0].mxu0 %vm62_vm0, %v57_v4  ;;  %p262_p0 = pnand %p261_p13, %p255_p10 }
 0x110   :  { %v177_v7 = vpop.f32.mrb[0].mxu0 }
 0x111   :  { %v141_v8 = vadd.f32 %v177_v7, %v61_v5  ;;  %v135_v9 = vpop.f32.mrb[1].mxu0 }
 0x112   :  { %v136_v10 = vadd.f32 %v135_v9, %v60_v6 }
 0x113   :  { %146 = vst.msk [vmem:[#allocation8 + $0x8] sm:$0xff] %vm144_vm1, %v141_v8 }
 0x114   :  { %145 = vst.msk [vmem:[#allocation8] sm:$0xff] %vm144_vm1, %v136_v10 }
 0x115   :  { %265 = shalt.err (!%p262_p0)
}
 0x116   :  { %s266_s27 = scalar_lea.hbm %s378_s3, 256 }
 0x117   :  { %p267_p1 = scmp.ne.s32.totalorder %s378_s3, %s266_s27  ;;  %p270_p2 = scmp.lt.u32.totalorder %s266_s27, %s378_s3 }
 0x119   :  { %p272_p3 = pnand %p270_p2, %p267_p1 }
 0x11b   :  { %275 = shalt.err (!%p272_p3)
}
 0x11c   :  { %158 = dma.vmem_to_hbm [thread:$0]  %s153_s22, 256, %s378_s3, [#allocation4], %s284_s24, %s284_s24, %s285_s25  }
 0x11d   :  { %280 = dma.done.wait [#allocation4], 256  }
 0x11e   :  { %281 = vsyncadd [#allocation4], 4294967040 }
 0x11f   :  { %162 = vsyncpa [#allocation3], 1 }
 0x120   :  { %163 = vsyncpa [#allocation6], 1 }
 0x121   :  { %164 = vsyncpa [#allocation4], 1 }

</bundles_post_ra>
